<compile_context>
chip_gen: v5e
topology: v5e:2x2
jax: 0.10.0
libtpu: 0.0.40
codegen_flags: <defaults>
</compile_context>

<pallas_src>
import jax
import jax.numpy as jnp
from jax.experimental import pallas as pl
from jax.experimental.pallas import tpu as pltpu

_LANE = 128          # vreg lane width
_SUBLANE = 8         # f32 sublane count
_MAX_COLS = 2048     # cap on slab width (keeps index math / layout simple)
_TARGET_BLOCK_BYTES = 2 * 1024 * 1024   # ~2 MiB/block -> ~8 MiB resident w/ double-buffered in+out


def _copy_kernel(x_ref, o_ref):
    # Identity passthrough of the current lane-dense block.
    o_ref[...] = x_ref[...]


def base_feature_extractor_forward(x: jax.Array) -> jax.Array:
    """Pallas implementation of BaseFeatureExtractor.forward (identity).

    NOTE: the true optimum for identity semantics is `return x` (no kernel,
    no HBM round-trip). The Pallas copy below is kept as the required data
    path, laid out to run at HBM roofline.
    """
    total = x.size
    itemsize = jnp.dtype(x.dtype).itemsize

    # Fallback: tiny/odd sizes that don't tile into (8, 128) — single
    # whole-array VMEM copy, no grid.
    if total % (_LANE * _SUBLANE) != 0:
        return pl.pallas_call(
            _copy_kernel,
            out_shape=jax.ShapeDtypeStruct(x.shape, x.dtype),
        )(x)

    # Lane-dense 2D slab: (rows, cols) with cols a multiple of 128 and rows a
    # multiple of 8. Widen cols (halving rows) while divisibility allows.
    cols = _LANE
    rows = total // cols
    while rows % (2 * _SUBLANE) == 0 and cols < _MAX_COLS:
        cols *= 2
        rows //= 2
    x2d = x.reshape(rows, cols)

    # Row-block sized so one block stays near the ~2 MiB sweet spot (amortizes
    # the ~600-cycle per-grid-step overhead; fits every generation's VMEM with
    # default double-buffering). For the demo tensor this is the whole slab.
    rows_per_block = (_TARGET_BLOCK_BYTES // (cols * itemsize)) // _SUBLANE * _SUBLANE
    block_rows = int(max(_SUBLANE, min(rows, rows_per_block)))
    grid_rows = pl.cdiv(rows, block_rows)

    y2d = pl.pallas_call(
        _copy_kernel,
        out_shape=jax.ShapeDtypeStruct((rows, cols), x.dtype),
        grid=(grid_rows,),
        in_specs=[pl.BlockSpec((block_rows, cols), lambda i: (i, 0))],
        out_specs=pl.BlockSpec((block_rows, cols), lambda i: (i, 0)),
        compiler_params=pltpu.CompilerParams(
            # "parallel" lets v7x shard row-blocks across its two TensorCores;
            # no-op on single-TC v5e/v6e.
            dimension_semantics=("parallel",),
            # Explicit headroom above v5e's 16 MiB scoped default; safely
            # below v7x's 64 MiB physical VMEM.
            vmem_limit_bytes=32 * 1024 * 1024,
        ),
    )(x2d)

    return y2d.reshape(x.shape)


if __name__ == "__main__":
    key = jax.random.PRNGKey(0)
    # Small NCHW input consistent with a feature-extractor module.
    x = jax.random.normal(key, (2, 4, 16, 16), dtype=jnp.float32)

    y = base_feature_extractor_forward(x)
    y = jax.block_until_ready(y)

    assert y.shape == x.shape and y.dtype == x.dtype
    assert jnp.allclose(y, x), "identity passthrough mismatch"
    print("KERNEL_OK")
</pallas_src>

<mosaic_0001>
module attributes {stable_mosaic.version = 11 : i64} {
  func.func @_copy_kernel(%arg0: i32, %arg1: memref<8x256xf32, #tpu.memory_space<vmem>>, %arg2: memref<8x256xf32, #tpu.memory_space<vmem>>) attributes {dimension_semantics = [#tpu.dimension_semantics<parallel>], iteration_bounds = array<i64: 1>, scalar_prefetch = 0 : i64, scratch_operands = 0 : i64, tpu.core_type = #tpu.core_type<tc>, window_params = [{transform_indices = @transform_0, window_bounds = array<i64: 8, 256>}, {transform_indices = @transform_1, window_bounds = array<i64: 8, 256>}]} {
    %c0 = arith.constant 0 : index
    %c0_0 = arith.constant 0 : index
    %0 = vector.load %arg1[%c0, %c0_0] : memref<8x256xf32, #tpu.memory_space<vmem>>, vector<8x256xf32>
    %c0_1 = arith.constant 0 : index
    %c0_2 = arith.constant 0 : index
    %1 = vector.load %arg2[%c0_1, %c0_2] : memref<8x256xf32, #tpu.memory_space<vmem>>, vector<8x256xf32>
    tpu.vector_store %arg2[%c0_1, %c0_2], %0 {strides = array<i32>} : memref<8x256xf32, #tpu.memory_space<vmem>>, vector<8x256xf32>,
    return
  }
  func.func @transform_0(%arg0: i32) -> (i32, i32) {
    %c0_i32 = arith.constant 0 : i32
    %c0_i32_0 = arith.constant 0 : i32
    return %arg0, %c0_i32 : i32, i32
  }
  func.func @transform_1(%arg0: i32) -> (i32, i32) {
    %c0_i32 = arith.constant 0 : i32
    %c0_i32_0 = arith.constant 0 : i32
    return %arg0, %c0_i32 : i32, i32
  }
}

</mosaic_0001>

<bundles_post_ra>
// kernel: tpu_custom_call.1
= control target key start
LH: loop header
LB: loop body
LE: loop exit
PB: predicated region body
PF: predicated region fallthrough
CT: control target
= control target key end

     0   :  { %6 = vsyncpa [#allocation3], 0  ;;  %s116_s0 = inlined_call_operand.hbm [shape: f32[8,256], index: 0, kind: input, shape index: {}]   ;;  %s117_s1 = inlined_call_operand.hbm [shape: f32[8,256], index: 1, kind: output, shape index: {}]  }
   0x1   :  { %7 = vsyncpa [#allocation4], 0  ;;  %s13_s8 = sshll.u32 %s116_s0, 4  ;;  %s98_s9 = smov [#allocation2]   ;;  %s14_s8 = int_to_ptr.hbm [resolvable:$true] %s13_s8 }
   0x2   :  { %s15_s10 = sshll.u32 %s98_s9, 4  ;;  %s16_s10 = int_to_ptr.vmem [resolvable:$true] %s15_s10 }
   0x3   :  { %18 = dma.hbm_to_vmem [thread:$0]  %s14_s8, 256, %s16_s10, [#allocation3]  }
   0x4   :  { %94 = dma.done.wait [#allocation3], 256  }
   0x5   :  { %95 = vsyncadd [#allocation3], 4294967040  ;;  %s99_s11 = smov [#allocation5]   ;;  %s34_s15 = sshll.u32 %s117_s1, 4  ;;  %v23_v0 = vld [vmem:[#allocation2] sm:$0xff]  ;;  %v24_v1 = vld [vmem:[#allocation2 + $0x8] sm:$0xff]  ;;  %s35_s15 = int_to_ptr.hbm [resolvable:$true] %s34_s15 }
   0x6   :  { %s32_s12 = sshll.u32 %s99_s11, 4  ;;  %25 = vst [vmem:[#allocation5] sm:$0xff] %v23_v0  ;;  %s33_s12 = int_to_ptr.vmem [resolvable:$true] %s32_s12 }
   0x7   :  { %26 = vst [vmem:[#allocation5 + $0x8] sm:$0xff] %v24_v1 }
   0x8   :  { %37 = dma.vmem_to_hbm [thread:$0]  %s33_s12, 256, %s35_s15, [#allocation4]  }
   0x9   :  { %96 = dma.done.wait [#allocation4], 256  }
   0xa   :  { %97 = vsyncadd [#allocation4], 4294967040 }
   0xb   :  { %42 = vsyncpa [#allocation3], 1 }
   0xc   :  { %43 = vsyncpa [#allocation4], 1 }

</bundles_post_ra>
